<compile_context>
chip_gen: v6e
topology: v6e:2x2x1
jax: 0.10.0
libtpu: 0.0.40
codegen_flags: <defaults>
</compile_context>

<pallas_src>
import jax
import jax.numpy as jnp
from jax.experimental import pallas as pl
from jax.experimental.pallas import tpu as pltpu


PRESERVE_RATIO = 0.1


def _round_up(x, m):
    return ((x + m - 1) // m) * m


def gcn_kernel(a_ref, x_ref, w_ref, b_ref, o_ref):
    """Whole GCN stack in one invocation; every operand resident in VMEM.

    a_ref: (Np, Np)    bf16  normalized adjacency, A_hat[dst, src]
    x_ref: (Np, Dp)    f32   input node features
    w_ref: (L, Dp, Dp) bf16  stacked layer weights (pre-scaled by 1 - r)
    b_ref: (L, 1, Dp)  f32   stacked layer biases  (pre-scaled by 1 - r)
    o_ref: (Np, Dp)    f32   output node features
    """
    n_layers = w_ref.shape[0]

    def layer(l, h):
        w = w_ref[l]                                   # (Dp, Dp) bf16
        b = b_ref[l]                                   # (1, Dp)  f32
        # GCNConv: A_hat @ (H @ W) + b -- bf16 MXU operands, f32 accumulation.
        xw = jnp.dot(h.astype(jnp.bfloat16), w,
                     preferred_element_type=jnp.float32)      # (Np, Dp) f32
        # Load A_hat inside the layer body so its live range is per-layer
        # (avoids vreg spills at large Np; neutral at small Np).
        agg = jnp.dot(a_ref[...], xw.astype(jnp.bfloat16),
                      preferred_element_type=jnp.float32)     # (Np, Dp) f32
        # Residual preserve-ratio blend (0.9 folded into W/b in the wrapper).
        return agg + b + PRESERVE_RATIO * h

    unroll = True if n_layers <= 4 else 2
    h = jax.lax.fori_loop(0, n_layers, layer, x_ref[...], unroll=unroll)
    o_ref[...] = h


def gcn_forward(skill_embed, adj_list, edge_attr, weights, biases):
    """skill_embed: (N, D) f32, adj_list: (2, E) i32, edge_attr: (E,) f32,
    weights: (L, D, D), biases: (L, D)."""
    N, D = skill_embed.shape
    L = weights.shape[0]

    # Lane-dense padding: Np multiple of 128 -> dense lanes for bf16 A_hat and
    # a full-width MXU contraction in the aggregation matmul; Dp likewise.
    Np = _round_up(N, 128)
    Dp = _round_up(D, 128)

    # ---- plain-JAX glue: normalized dense adjacency (PyG gcn_norm) ----------
    src = adj_list[0]
    dst = adj_list[1]
    ew = edge_attr.astype(jnp.float32)
    self_mask = src == dst

    # add_remaining_self_loops semantics: drop existing self-loops from the
    # edge list, add exactly one self-loop per node whose weight is the
    # existing self-loop weight (if present) else 1.0.
    w_off = jnp.where(self_mask, 0.0, ew)                       # off-diagonal
    loop_idx = jnp.arange(N, dtype=src.dtype)
    loop_w = (jnp.ones((N,), jnp.float32)
              .at[jnp.where(self_mask, src, N)]
              .set(ew, mode="drop"))                            # diagonal

    # degree indexed by destination node
    deg = jnp.zeros((N,), jnp.float32).at[dst].add(w_off) + loop_w
    deg_inv_sqrt = jnp.where(deg > 0, jax.lax.rsqrt(deg), 0.0)
    norm_off = deg_inv_sqrt[src] * w_off * deg_inv_sqrt[dst]
    norm_loop = deg_inv_sqrt * loop_w * deg_inv_sqrt

    # Scatter directly into the padded buffer and cast to bf16 once
    # (no intermediate (N, N) array). A_hat[dst, src] = norm.
    a_pad = (jnp.zeros((Np, Np), jnp.float32)
             .at[dst, src].add(norm_off)
             .at[loop_idx, loop_idx].add(norm_loop)
             ).astype(jnp.bfloat16)

    # ---- pad / pre-scale parameters -----------------------------------------
    scale = 1.0 - PRESERVE_RATIO
    x_pad = jnp.zeros((Np, Dp), jnp.float32).at[:N, :D].set(
        skill_embed.astype(jnp.float32))
    w_pad = jnp.zeros((L, Dp, Dp), jnp.bfloat16).at[:, :D, :D].set(
        (scale * weights.astype(jnp.float32)).astype(jnp.bfloat16))
    b_pad = jnp.zeros((L, 1, Dp), jnp.float32).at[:, 0, :D].set(
        scale * biases.astype(jnp.float32))

    # Scoped-VMEM budget for the fully resident formulation (defaults are only
    # 16 MiB on v5e, 32 MiB on v6e/v7x).
    resident_bytes = (2 * Np * Np          # A_hat bf16
                      + 2 * 4 * Np * Dp    # X f32 + output f32
                      + 2 * L * Dp * Dp    # stacked W bf16
                      + 4 * L * Dp)        # stacked b f32
    vmem_limit = int(min(max(2 * resident_bytes + (8 << 20), 16 << 20),
                         100 << 20))

    out = pl.pallas_call(
        gcn_kernel,
        out_shape=jax.ShapeDtypeStruct((Np, Dp), jnp.float32),
        in_specs=[
            pl.BlockSpec(memory_space=pltpu.MemorySpace.VMEM),  # A_hat (bf16)
            pl.BlockSpec(memory_space=pltpu.MemorySpace.VMEM),  # X
            pl.BlockSpec(memory_space=pltpu.MemorySpace.VMEM),  # stacked W
            pl.BlockSpec(memory_space=pltpu.MemorySpace.VMEM),  # stacked b
        ],
        out_specs=pl.BlockSpec(memory_space=pltpu.MemorySpace.VMEM),
        compiler_params=pltpu.CompilerParams(vmem_limit_bytes=vmem_limit),
    )(a_pad, x_pad, w_pad, b_pad)

    return out[:N, :D].astype(skill_embed.dtype)


def glorot(key, shape):
    fan_in, fan_out = shape[-2], shape[-1]
    limit = (6.0 / (fan_in + fan_out)) ** 0.5
    return jax.random.uniform(key, shape, jnp.float32, -limit, limit)


if __name__ == "__main__":
    # Small deterministic setup: N=16 skill nodes, D=32 embed dim, 2 GCN layers.
    N, D, L, E = 16, 32, 2, 24
    key = jax.random.PRNGKey(0)
    k_x, k_src, k_dst, k_ea, k_w = jax.random.split(key, 5)

    skill_embed = jax.random.normal(k_x, (N, D), jnp.float32)
    adj_list = jnp.stack(
        [
            jax.random.randint(k_src, (E,), 0, N, jnp.int32),
            jax.random.randint(k_dst, (E,), 0, N, jnp.int32),
        ],
        axis=0,
    )  # (2, E)
    edge_attr = jax.random.uniform(k_ea, (E,), jnp.float32, 0.1, 1.0)

    # GCNConv params: glorot weights, zero biases (deterministic, synthetic).
    wkeys = jax.random.split(k_w, L)
    weights = jnp.stack([glorot(wkeys[i], (D, D)) for i in range(L)], axis=0)
    biases = jnp.zeros((L, D), jnp.float32)

    out = gcn_forward(skill_embed, adj_list, edge_attr, weights, biases)
    jax.block_until_ready(out)
    assert out.shape == (N, D) and out.dtype == jnp.float32
    print("KERNEL_OK")
</pallas_src>

<mosaic_0001>
module attributes {stable_mosaic.version = 11 : i64} {
  func.func @gcn_kernel(%arg0: memref<128x128xbf16, #tpu.memory_space<vmem>>, %arg1: memref<128x128xf32, #tpu.memory_space<vmem>>, %arg2: memref<2x128x128xbf16, #tpu.memory_space<vmem>>, %arg3: memref<2x1x128xf32, #tpu.memory_space<vmem>>, %arg4: memref<128x128xf32, #tpu.memory_space<vmem>>) attributes {dimension_semantics = [], scalar_prefetch = 0 : i64, scratch_operands = 0 : i64, tpu.core_type = #tpu.core_type<tc>} {
    %c0 = arith.constant 0 : index
    %c0_0 = arith.constant 0 : index
    %0 = vector.load %arg1[%c0, %c0_0] : memref<128x128xf32, #tpu.memory_space<vmem>>, vector<128x128xf32>
    %c0_i32 = arith.constant 0 : i32
    %1 = arith.index_cast %c0_i32 : i32 to index
    %c0_1 = arith.constant 0 : index
    %c0_2 = arith.constant 0 : index
    %2 = vector.load %arg2[%1, %c0_1, %c0_2] : memref<2x128x128xbf16, #tpu.memory_space<vmem>>, vector<1x128x128xbf16>
    %3 = vector.shape_cast %2 : vector<1x128x128xbf16> to vector<128x128xbf16>
    %4 = arith.index_cast %c0_i32 : i32 to index
    %c0_3 = arith.constant 0 : index
    %c0_4 = arith.constant 0 : index
    %5 = vector.load %arg3[%4, %c0_3, %c0_4] : memref<2x1x128xf32, #tpu.memory_space<vmem>>, vector<1x1x128xf32>
    %6 = vector.shape_cast %5 : vector<1x1x128xf32> to vector<1x128xf32>
    %7 = arith.truncf %0 : vector<128x128xf32> to vector<128x128xbf16>
    %cst = arith.constant dense<0.000000e+00> : vector<128x128xf32>
    %8 = tpu.matmul %7, %3, %cst {dimension_numbers = #tpu.dot_dimension_numbers<[1], [0], [0], [1], [0, 0, 1, 1], [], []>} : vector<128x128xbf16>, vector<128x128xbf16>, vector<128x128xf32> -> vector<128x128xf32>
    %c0_5 = arith.constant 0 : index
    %c0_6 = arith.constant 0 : index
    %9 = vector.load %arg0[%c0_5, %c0_6] : memref<128x128xbf16, #tpu.memory_space<vmem>>, vector<128x128xbf16>
    %10 = arith.truncf %8 : vector<128x128xf32> to vector<128x128xbf16>
    %cst_7 = arith.constant dense<0.000000e+00> : vector<128x128xf32>
    %11 = tpu.matmul %9, %10, %cst_7 {dimension_numbers = #tpu.dot_dimension_numbers<[1], [0], [0], [1], [0, 0, 1, 1], [], []>} : vector<128x128xbf16>, vector<128x128xbf16>, vector<128x128xf32> -> vector<128x128xf32>
    %12 = vector.broadcast %6 : vector<1x128xf32> to vector<128x128xf32>
    %13 = arith.addf %11, %12 : vector<128x128xf32>
    %cst_8 = arith.constant 1.000000e-01 : f32
    %14 = vector.broadcast %cst_8 : f32 to vector<128x128xf32>
    %15 = arith.mulf %14, %0 : vector<128x128xf32>
    %16 = arith.addf %13, %15 : vector<128x128xf32>
    %c1_i32 = arith.constant 1 : i32
    %17 = arith.index_cast %c1_i32 : i32 to index
    %c0_9 = arith.constant 0 : index
    %c0_10 = arith.constant 0 : index
    %18 = vector.load %arg2[%17, %c0_9, %c0_10] : memref<2x128x128xbf16, #tpu.memory_space<vmem>>, vector<1x128x128xbf16>
    %19 = vector.shape_cast %18 : vector<1x128x128xbf16> to vector<128x128xbf16>
    %20 = arith.index_cast %c1_i32 : i32 to index
    %c0_11 = arith.constant 0 : index
    %c0_12 = arith.constant 0 : index
    %21 = vector.load %arg3[%20, %c0_11, %c0_12] : memref<2x1x128xf32, #tpu.memory_space<vmem>>, vector<1x1x128xf32>
    %22 = vector.shape_cast %21 : vector<1x1x128xf32> to vector<1x128xf32>
    %23 = arith.truncf %16 : vector<128x128xf32> to vector<128x128xbf16>
    %cst_13 = arith.constant dense<0.000000e+00> : vector<128x128xf32>
    %24 = tpu.matmul %23, %19, %cst_13 {dimension_numbers = #tpu.dot_dimension_numbers<[1], [0], [0], [1], [0, 0, 1, 1], [], []>} : vector<128x128xbf16>, vector<128x128xbf16>, vector<128x128xf32> -> vector<128x128xf32>
    %c0_14 = arith.constant 0 : index
    %c0_15 = arith.constant 0 : index
    %25 = vector.load %arg0[%c0_14, %c0_15] : memref<128x128xbf16, #tpu.memory_space<vmem>>, vector<128x128xbf16>
    %26 = arith.truncf %24 : vector<128x128xf32> to vector<128x128xbf16>
    %cst_16 = arith.constant dense<0.000000e+00> : vector<128x128xf32>
    %27 = tpu.matmul %25, %26, %cst_16 {dimension_numbers = #tpu.dot_dimension_numbers<[1], [0], [0], [1], [0, 0, 1, 1], [], []>} : vector<128x128xbf16>, vector<128x128xbf16>, vector<128x128xf32> -> vector<128x128xf32>
    %28 = vector.broadcast %22 : vector<1x128xf32> to vector<128x128xf32>
    %29 = arith.addf %27, %28 : vector<128x128xf32>
    %cst_17 = arith.constant 1.000000e-01 : f32
    %30 = vector.broadcast %cst_17 : f32 to vector<128x128xf32>
    %31 = arith.mulf %30, %16 : vector<128x128xf32>
    %32 = arith.addf %29, %31 : vector<128x128xf32>
    %c2_i32 = arith.constant 2 : i32
    %c0_18 = arith.constant 0 : index
    %c0_19 = arith.constant 0 : index
    %33 = vector.load %arg4[%c0_18, %c0_19] : memref<128x128xf32, #tpu.memory_space<vmem>>, vector<128x128xf32>
    tpu.vector_store %arg4[%c0_18, %c0_19], %32 {strides = array<i32>} : memref<128x128xf32, #tpu.memory_space<vmem>>, vector<128x128xf32>,
    return
  }
}

</mosaic_0001>

<bundles_post_ra>
// kernel: tpu_custom_call.1
= control target key start
LH: loop header
LB: loop body
LE: loop exit
PB: predicated region body
PF: predicated region fallthrough
CT: control target
= control target key end

     0   :  { %9 = vsyncpa [#allocation3], 0  ;;  %s1392_s0 = inlined_call_operand.hbm [shape: bf16[128,128], index: 0, kind: input, shape index: {}]   ;;  %s1393_s1 = inlined_call_operand.hbm [shape: f32[128,128], index: 1, kind: input, shape index: {}]   ;;  %s1394_s2 = inlined_call_operand.hbm [shape: bf16[2,128,128], index: 2, kind: input, shape index: {}]   ;;  %s1395_s3 = inlined_call_operand.vmem [shape: f32[2,1,128], index: 3, kind: input, shape index: {}]   ;;  %s1396_s4 = inlined_call_operand.hbm [shape: f32[128,128], index: 4, kind: output, shape index: {}]  }
   0x1   :  { %10 = vsyncpa [#allocation6], 0 }
   0x2   :  { %11 = vsyncpa [#allocation4], 0  ;;  %s1139_s15 = smov [#allocation5]  }
   0x3   :  { %s29_s16 = sshll.u32 %s1139_s15, 4  ;;  %s30_s16 = int_to_ptr.vmem [resolvable:$true] %s29_s16 }
   0x4   :  { %s1061_s17 = scalar_lea.vmem %s30_s16, 2048  ;;  %p1066_p1 = scmp.lt.s32.totalorder %s30_s16, %s30_s16 }
   0x5   :  { %p1062_p0 = scmp.ne.s32.totalorder %s30_s16, %s1061_s17  ;;  %p1067_p2 = scmp.lt.s32.totalorder %s1061_s17, %s1061_s17 }
   0x7   :  { %p1068_p3 = por %p1067_p2, %p1066_p1 }
   0x9   :  { %p1069_p4 = pnand %p1068_p3, %p1062_p0 }
   0xb   :  { %1072 = shalt.err (!%p1069_p4)
}
   0xc   :  { %s1140_s18 = smov 128   ;;  %s1141_s19 = smov 8  }
   0xd   :  { %35 = dma.hbm_to_vmem [thread:$0]  %s1393_s1, 2048, %s30_s16, [#allocation6], %s1140_s18, %s1140_s18, %s1141_s19  }
   0xe   :  { %s1142_s22 = smov [#allocation2]  }
   0xf   :  { %s17_s23 = sshll.u32 %s1142_s22, 4  ;;  %s18_s23 = int_to_ptr.vmem [resolvable:$true] %s17_s23 }
  0x10   :  { %s1081_s24 = scalar_lea.vmem %s18_s23, 1024  ;;  %p1086_p6 = scmp.lt.s32.totalorder %s18_s23, %s18_s23 }
  0x11   :  { %p1082_p5 = scmp.ne.s32.totalorder %s18_s23, %s1081_s24  ;;  %p1087_p7 = scmp.lt.s32.totalorder %s1081_s24, %s1081_s24 }
  0x13   :  { %p1088_p8 = por %p1087_p7, %p1086_p6 }
  0x15   :  { %p1089_p9 = pnand %p1088_p8, %p1082_p5 }
  0x17   :  { %1092 = shalt.err (!%p1089_p9)
}
  0x18   :  { %s1143_s25 = smov 64   ;;  %s1144_s26 = smov 4  }
  0x19   :  { %23 = dma.hbm_to_vmem [thread:$0]  %s1392_s0, 1024, %s18_s23, [#allocation3], %s1143_s25, %s1143_s25, %s1144_s26  }
  0x1a   :  { %s1145_s29 = smov [#allocation7]  }
  0x1b   :  { %s41_s30 = sshll.u32 %s1145_s29, 4  ;;  %s42_s30 = int_to_ptr.vmem [resolvable:$true] %s41_s30 }
  0x1c   :  { %s1101_s1 = scalar_lea.vmem %s42_s30, 2048  ;;  %p1106_p11 = scmp.lt.s32.totalorder %s42_s30, %s42_s30 }
  0x1d   :  { %p1102_p10 = scmp.ne.s32.totalorder %s42_s30, %s1101_s1  ;;  %p1107_p12 = scmp.lt.s32.totalorder %s1101_s1, %s1101_s1 }
  0x1f   :  { %p1108_p13 = por %p1107_p12, %p1106_p11 }
  0x21   :  { %p1109_p0 = pnand %p1108_p13, %p1102_p10 }
  0x23   :  { %1112 = shalt.err (!%p1109_p0)
}
  0x24   :  { %47 = dma.hbm_to_vmem [thread:$0]  %s1394_s2, 2048, %s42_s30, [#allocation6], %s1143_s25, %s1143_s25, %s1144_s26  }
  0x25   :  { %1133 = dma.done.wait [#allocation3], 1024  }
  0x26   :  { %1134 = vsyncadd [#allocation3], 4294966272 }
  0x27   :  { %1135 = dma.done.wait [#allocation6], 4096  }
  0x28   :  { %1136 = vsyncadd [#allocation6], 4294963200  ;;  %v1029_v0 = vld [vmem:[#allocation7 + $0x38] sm:$0xff]   ;;  %v1030_v1 = vld [vmem:[#allocation7 + $0x30] sm:$0xff]  }
  0x29   :  { %893 = vmatprep.subr.bf16.mxu0 %v1029_v0  ;;  %v1031_v2 = vld [vmem:[#allocation7 + $0x28] sm:$0xff]   ;;  %v1032_v3 = vld [vmem:[#allocation7 + $0x20] sm:$0xff]   ;;  %v1033_v7 = vld [vmem:[#allocation7 + $0x18] sm:$0xff]  }
  0x2a   :  { %894 = vmatpush3.bf16.msra.mxu0 %v1029_v0  ;;  %v1184_v4 = vld [vmem:[#allocation5] sm:$0xff]  ;;  %v1186_v5 = vld [vmem:[#allocation5 + $0x8] sm:$0xff]  ;;  %v1034_v8 = vld [vmem:[#allocation7 + $0x10] sm:$0xff]  }
  0x2b   :  { %895 = vmatprep.subr.bf16.mxu0 %v1030_v1  ;;  %v93_v6 = vpack.c.bf16 %v1186_v5, %v1184_v4  ;;  %v1035_v9 = vld [vmem:[#allocation7 + $0x8] sm:$0xff]   ;;  %v1036_v10 = vld [vmem:[#allocation7] sm:$0xff]   ;;  %v1190_v11 = vld [vmem:[#allocation5 + $0x10] sm:$0xff] }
  0x2c   :  { %v1192_v12 = vld [vmem:[#allocation5 + $0x18] sm:$0xff]  ;;  %v1194_v13 = vld [vmem:[#allocation5 + $0x20] sm:$0xff]  ;;  %v1196_v14 = vld [vmem:[#allocation5 + $0x28] sm:$0xff] }
  0x2d   :  { %909 = vmatprep.mubr.bf16.mxu0 %v93_v6  ;;  %v94_v15 = vpack.c.bf16 %v1192_v12, %v1190_v11  ;;  %v95_v16 = vpack.c.bf16 %v1196_v14, %v1194_v13  ;;  %v1202_v17 = vld [vmem:[#allocation5 + $0x30] sm:$0xff]  ;;  %v1204_v18 = vld [vmem:[#allocation5 + $0x38] sm:$0xff]  ;;  %v1206_v19 = vld [vmem:[#allocation5 + $0x40] sm:$0xff] }
  0x2e   :  { %896 = vmatpush3.bf16.msra.mxu0 %v1030_v1  ;;  %v1208_v20 = vld [vmem:[#allocation5 + $0x48] sm:$0xff]  ;;  %v96_v21 = vpack.c.bf16 %v1204_v18, %v1202_v17  ;;  %v1214_v23 = vld [vmem:[#allocation5 + $0x50] sm:$0xff]  ;;  %v1216_v24 = vld [vmem:[#allocation5 + $0x58] sm:$0xff] }
  0x2f   :  { %897 = vmatprep.subr.bf16.mxu0 %v1031_v2  ;;  %v97_v22 = vpack.c.bf16 %v1208_v20, %v1206_v19  ;;  %v1218_v25 = vld [vmem:[#allocation5 + $0x60] sm:$0xff]  ;;  %v1220_v26 = vld [vmem:[#allocation5 + $0x68] sm:$0xff]  ;;  %v98_v27 = vpack.c.bf16 %v1216_v24, %v1214_v23  ;;  %v1226_v29 = vld [vmem:[#allocation5 + $0x70] sm:$0xff] }
  0x30   :  { %v99_v28 = vpack.c.bf16 %v1220_v26, %v1218_v25  ;;  %v1228_v30 = vld [vmem:[#allocation5 + $0x78] sm:$0xff]  ;;  %v1232_v32 = vld [vmem:[#allocation2] sm:$0xff]   ;;  %v1046_v34 = vld [vmem:[#allocation7 + $0x70] sm:$0xff]  }
  0x31   :  { %v100_v31 = vpack.c.bf16 %v1228_v30, %v1226_v29  ;;  %941 = vmatprep.mubr.bf16.mxu1 %v1232_v32  ;;  %v1045_v33 = vld [vmem:[#allocation7 + $0x78] sm:$0xff]   ;;  %v1047_v35 = vld [vmem:[#allocation7 + $0x68] sm:$0xff]   ;;  %v1048_v36 = vld [vmem:[#allocation7 + $0x60] sm:$0xff]  }
  0x32   :  { %898 = vmatpush3.bf16.msra.mxu0 %v1031_v2  ;;  %v1049_v37 = vld [vmem:[#allocation7 + $0x58] sm:$0xff]   ;;  %v1235_v62 = vld [vmem:[#allocation2 + $0x8] sm:$0xff]   ;;  %v1237_v63 = vld [vmem:[#allocation2 + $0x10] sm:$0xff]  }
  0x33   :  { %899 = vmatprep.subr.bf16.mxu0 %v1032_v3  ;;  %v1241_v0 = vld [vmem:[#allocation2 + $0x18] sm:$0xff]   ;;  %v1243_v1 = vld [vmem:[#allocation2 + $0x20] sm:$0xff]   ;;  %v1247_v2 = vld [vmem:[#allocation2 + $0x28] sm:$0xff]  }
  0x34   :  { %v1253_v6 = vld [vmem:[#allocation2 + $0x38] sm:$0xff]  }
  0x36   :  { %900 = vmatpush3.bf16.msra.mxu0 %v1032_v3  ;;  %v1249_v3 = vld [vmem:[#allocation2 + $0x30] sm:$0xff]  }
  0x37   :  { %901 = vmatprep.subr.bf16.mxu0 %v1033_v7 }
  0x3a   :  { %902 = vmatpush3.bf16.msra.mxu0 %v1033_v7  ;;  %v1050_v7 = vld [vmem:[#allocation7 + $0x50] sm:$0xff]  }
  0x3b   :  { %903 = vmatprep.subr.bf16.mxu0 %v1034_v8 }
  0x3e   :  { %904 = vmatpush3.bf16.msra.mxu0 %v1034_v8  ;;  %v1051_v8 = vld [vmem:[#allocation7 + $0x48] sm:$0xff]  }
  0x3f   :  { %905 = vmatprep.subr.bf16.mxu0 %v1035_v9 }
  0x42   :  { %906 = vmatpush3.bf16.msra.mxu0 %v1035_v9  ;;  %v1052_v9 = vld [vmem:[#allocation7 + $0x40] sm:$0xff]  }
  0x43   :  { %907 = vmatprep.subr.bf16.mxu0 %v1036_v10 }
  0x46   :  { %908 = vmatpush3.bf16.msra.mxu0 %v1036_v10 }
  0x47   :  { %957 = vmatprep.subr.bf16.mxu0 %v1045_v33 }
  0x49   :  { %910 = vmatmul.mubr.bf16.vlgmr.msra.gmra.mxu0 %v94_v15 }
  0x4a   :  { %913 = vmatprep.mubr.bf16.mxu0 %v95_v16  ;;  %958 = vmatpush3.bf16.msra.mxu0 %v1045_v33  ;;  %v1260_v16 = vld [vmem:[%s1395_s3] ss:$0 sm:$0xff] }
  0x4b   :  { %959 = vmatprep.subr.bf16.mxu0 %v1046_v34 }
  0x4e   :  { %960 = vmatpush3.bf16.msra.mxu0 %v1046_v34  ;;  %v423_v34 = vmul.f32 0.1, %v1190_v11 }
  0x4f   :  { %961 = vmatprep.subr.bf16.mxu0 %v1047_v35 }
  0x51   :  { %914 = vmatmul.mubr.bf16.gmra.mxu0 %v96_v21 }
  0x52   :  { %917 = vmatprep.mubr.bf16.mxu0 %v97_v22  ;;  %962 = vmatpush3.bf16.msra.mxu0 %v1047_v35  ;;  %v424_v22 = vmul.f32 0.1, %v1192_v12 }
  0x53   :  { %963 = vmatprep.subr.bf16.mxu0 %v1048_v36 }
  0x56   :  { %964 = vmatpush3.bf16.msra.mxu0 %v1048_v36 }
  0x57   :  { %965 = vmatprep.subr.bf16.mxu0 %v1049_v37 }
  0x59   :  { %918 = vmatmul.mubr.bf16.gmra.mxu0 %v98_v27  ;;  %v421_v27 = vmul.f32 0.1, %v1184_v4 }
  0x5a   :  { %921 = vmatprep.mubr.bf16.mxu0 %v99_v28  ;;  %966 = vmatpush3.bf16.msra.mxu0 %v1049_v37  ;;  %v422_v28 = vmul.f32 0.1, %v1186_v5 }
  0x5b   :  { %967 = vmatprep.subr.bf16.mxu0 %v1050_v7 }
  0x5e   :  { %968 = vmatpush3.bf16.msra.mxu0 %v1050_v7  ;;  %v431_v7 = vmul.f32 0.1, %v1214_v23  ;;  %v436_v23 = vmul.f32 0.1, %v1228_v30 }
  0x5f   :  { %969 = vmatprep.subr.bf16.mxu0 %v1051_v8 }
  0x61   :  { %922 = vmatmul.mubr.bf16.gmra.mxu0 %v100_v31 }
  0x62   :  { %970 = vmatpush3.bf16.msra.mxu0 %v1051_v8 }
  0x63   :  { %971 = vmatprep.subr.bf16.mxu0 %v1052_v9 }
  0x66   :  { %972 = vmatpush3.bf16.msra.mxu0 %v1052_v9 }
 0x109   :  { %v911_v38 = vpop.f32.mrf.mxu0 }
 0x10b   :  { %v183_v39 = vpop.f32.mrf.mxu0 }
 0x10d   :  { %v912_v40 = vpop.f32.mrf.mxu0 }
 0x10e   :  { %v263_v60 = vpack.c.bf16 %v912_v40, %v911_v38 }
 0x10f   :  { %v186_v41 = vpop.f32.mrf.mxu0 }
 0x110   :  { %v262_v61 = vpack.c.bf16 %v186_v41, %v183_v39 }
 0x111   :  { %v915_v42 = vpop.f32.mrf.mxu0 }
 0x113   :  { %v199_v43 = vpop.f32.mrf.mxu0 }
 0x115   :  { %v916_v44 = vpop.f32.mrf.mxu0 }
 0x116   :  { %v265_v58 = vpack.c.bf16 %v916_v44, %v915_v42  ;;  %v428_v42 = vmul.f32 0.1, %v1204_v18  ;;  %v425_v44 = vmul.f32 0.1, %v1194_v13 }
 0x117   :  { %v202_v45 = vpop.f32.mrf.mxu0 }
 0x118   :  { %v264_v59 = vpack.c.bf16 %v202_v45, %v199_v43 }
 0x119   :  { %v919_v46 = vpop.f32.mrf.mxu0 }
 0x11b   :  { %v215_v47 = vpop.f32.mrf.mxu0 }
 0x11d   :  { %v920_v48 = vpop.f32.mrf.mxu0 }
 0x11e   :  { %v267_v56 = vpack.c.bf16 %v920_v48, %v919_v46  ;;  %v426_v46 = vmul.f32 0.1, %v1196_v14  ;;  %v427_v48 = vmul.f32 0.1, %v1202_v17  ;;  %v432_v17 = vmul.f32 0.1, %v1216_v24 }
 0x11f   :  { %v218_v49 = vpop.f32.mrf.mxu0 }
 0x120   :  { %v266_v57 = vpack.c.bf16 %v218_v49, %v215_v47 }
 0x121   :  { %v923_v50 = vpop.f32.mrf.mxu0 }
 0x123   :  { %v231_v51 = vpop.f32.mrf.mxu0 }
 0x125   :  { %v924_v52 = vpop.f32.mrf.mxu0 }
 0x126   :  { %v269_v53 = vpack.c.bf16 %v924_v52, %v923_v50 }
 0x127   :  { %v234_v54 = vpop.f32.mrf.mxu0 }
 0x128   :  { %v268_v55 = vpack.c.bf16 %v234_v54, %v231_v51  ;;  %925 = vmatprep.subr.bf16.mxu1 %v269_v53 }
 0x129   :  { %926 = vmatpush3.bf16.msra.mxu1 %v269_v53 }
 0x12a   :  { %927 = vmatprep.subr.bf16.mxu1 %v268_v55 }
 0x12d   :  { %928 = vmatpush3.bf16.msra.mxu1 %v268_v55 }
 0x12e   :  { %929 = vmatprep.subr.bf16.mxu1 %v267_v56 }
 0x131   :  { %930 = vmatpush3.bf16.msra.mxu1 %v267_v56 }
 0x132   :  { %931 = vmatprep.subr.bf16.mxu1 %v266_v57 }
 0x135   :  { %932 = vmatpush3.bf16.msra.mxu1 %v266_v57 }
 0x136   :  { %933 = vmatprep.subr.bf16.mxu1 %v265_v58 }
 0x139   :  { %934 = vmatpush3.bf16.msra.mxu1 %v265_v58  ;;  %v429_v58 = vmul.f32 0.1, %v1206_v19 }
 0x13a   :  { %935 = vmatprep.subr.bf16.mxu1 %v264_v59 }
 0x13d   :  { %936 = vmatpush3.bf16.msra.mxu1 %v264_v59 }
 0x13e   :  { %937 = vmatprep.subr.bf16.mxu1 %v263_v60 }
 0x141   :  { %938 = vmatpush3.bf16.msra.mxu1 %v263_v60  ;;  %v430_v60 = vmul.f32 0.1, %v1208_v20 }
 0x142   :  { %939 = vmatprep.subr.bf16.mxu1 %v262_v61 }
 0x145   :  { %940 = vmatpush3.bf16.msra.mxu1 %v262_v61 }
 0x148   :  { %942 = vmatmul.mubr.bf16.vlgmr.msra.gmra.mxu1 %v1235_v62 }
 0x149   :  { %945 = vmatprep.mubr.bf16.mxu1 %v1237_v63 }
 0x150   :  { %946 = vmatmul.mubr.bf16.gmra.mxu1 %v1241_v0 }
 0x151   :  { %949 = vmatprep.mubr.bf16.mxu1 %v1243_v1 }
 0x158   :  { %950 = vmatmul.mubr.bf16.gmra.mxu1 %v1247_v2 }
 0x159   :  { %953 = vmatprep.mubr.bf16.mxu1 %v1249_v3 }
 0x160   :  { %954 = vmatmul.mubr.bf16.gmra.mxu1 %v1253_v6 }
 0x161   :  { %1005 = vmatprep.mubr.bf16.mxu1 %v1232_v32 }
 0x208   :  { %v943_v10 = vpop.f32.mrf.mxu1 }
 0x209   :  { %v367_v33 = vadd.f32 %v943_v10, %v1260_v16 }
 0x20a   :  { %v358_v15 = vpop.f32.mrf.mxu1 }
 0x20b   :  { %v359_v31 = vadd.f32 %v1260_v16, %v358_v15  ;;  %v1276_v4 = vadd.f32 %v423_v34, %v367_v33  ;;  %v434_v34 = vmul.f32 0.1, %v1220_v26 }
 0x20c   :  { %v944_v21 = vpop.f32.mrf.mxu1 }
 0x20d   :  { %v370_v32 = vadd.f32 %v944_v21, %v1260_v16  ;;  %v1272_v39 = vadd.f32 %v421_v27, %v359_v31 }
 0x20e   :  { %v361_v35 = vpop.f32.mrf.mxu1 }
 0x20f   :  { %v362_v36 = vadd.f32 %v1260_v16, %v361_v35  ;;  %v1270_v37 = vadd.f32 %v424_v22, %v370_v32  ;;  %v433_v32 = vmul.f32 0.1, %v1218_v25 }
 0x210   :  { %v947_v38 = vpop.f32.mrf.mxu1 }
 0x211   :  { %v1274_v12 = vadd.f32 %v422_v28, %v362_v36  ;;  %v473_v41 = vpack.c.bf16 %v1270_v37, %v1276_v4  ;;  %v383_v47 = vadd.f32 %v947_v38, %v1260_v16  ;;  %v435_v36 = vmul.f32 0.1, %v1226_v29 }
 0x212   :  { %v374_v5 = vpop.f32.mrf.mxu1 }
 0x213   :  { %v472_v40 = vpack.c.bf16 %v1274_v12, %v1272_v39  ;;  %v375_v43 = vadd.f32 %v1260_v16, %v374_v5  ;;  %v1296_v13 = vadd.f32 %v427_v48, %v383_v47 }
 0x214   :  { %v948_v11 = vpop.f32.mrf.mxu1 }
 0x215   :  { %v386_v45 = vadd.f32 %v948_v11, %v1260_v16  ;;  %973 = vmatprep.mubr.bf16.mxu0 %v472_v40  ;;  %v1292_v52 = vadd.f32 %v425_v44, %v375_v43 }
 0x216   :  { %v377_v49 = vpop.f32.mrf.mxu1  ;;  %974 = vmatmul.mubr.bf16.vlgmr.msra.gmra.mxu0 %v473_v41 }
 0x217   :  { %v378_v50 = vadd.f32 %v1260_v16, %v377_v49  ;;  %v1290_v51 = vadd.f32 %v428_v42, %v386_v45 }
 0x218   :  { %v951_v18 = vpop.f32.mrf.mxu1 }
 0x219   :  { %v1294_v53 = vadd.f32 %v426_v46, %v378_v50  ;;  %v475_v56 = vpack.c.bf16 %v1290_v51, %v1296_v13  ;;  %v399_v61 = vadd.f32 %v951_v18, %v1260_v16 }
 0x21a   :  { %v390_v54 = vpop.f32.mrf.mxu1 }
 0x21b   :  { %v474_v14 = vpack.c.bf16 %v1294_v53, %v1292_v52  ;;  %v391_v57 = vadd.f32 %v1260_v16, %v390_v54  ;;  %v1316_v19 = vadd.f32 %v431_v7, %v399_v61 }
 0x21c   :  { %v952_v55 = vpop.f32.mrf.mxu1 }
 0x21d   :  { %v402_v59 = vadd.f32 %v952_v55, %v1260_v16  ;;  %977 = vmatprep.mubr.bf16.mxu0 %v474_v14  ;;  %v1312_v15 = vadd.f32 %v429_v58, %v391_v57 }
 0x21e   :  { %v393_v8 = vpop.f32.mrf.mxu1  ;;  %978 = vmatmul.mubr.bf16.gmra.mxu0 %v475_v56 }
 0x21f   :  { %v394_v24 = vadd.f32 %v1260_v16, %v393_v8  ;;  %v1310_v9 = vadd.f32 %v432_v17, %v402_v59 }
 0x220   :  { %v955_v10 = vpop.f32.mrf.mxu1 }
 0x221   :  { %v1314_v21 = vadd.f32 %v430_v60, %v394_v24  ;;  %v477_v28 = vpack.c.bf16 %v1310_v9, %v1316_v19  ;;  %v415_v35 = vadd.f32 %v955_v10, %v1260_v16  ;;  %v1352_v24 = vld [vmem:[%s1395_s3 + $0x1] ss:$0 sm:$0xff]  ;;  %s1146_s3 = smov [#allocation8]  }
 0x222   :  { %v406_v22 = vpop.f32.mrf.mxu1  ;;  %s789_s9 = sshll.u32 %s1146_s3, 4  ;;  %s790_s9 = int_to_ptr.vmem [resolvable:$true] %s789_s9 }
 0x223   :  { %v476_v20 = vpack.c.bf16 %v1314_v21, %v1312_v15  ;;  %v407_v31 = vadd.f32 %v1260_v16, %v406_v22  ;;  %v1336_v25 = vadd.f32 %v435_v36, %v415_v35  ;;  %s1113_s10 = scalar_lea.vmem %s790_s9, 2048  ;;  %p1118_p2 = scmp.lt.s32.totalorder %s790_s9, %s790_s9 }
 0x224   :  { %v956_v27 = vpop.f32.mrf.mxu1  ;;  %p1114_p1 = scmp.ne.s32.totalorder %s790_s9, %s1113_s10  ;;  %p1119_p3 = scmp.lt.s32.totalorder %s1113_s10, %s1113_s10 }
 0x225   :  { %v418_v33 = vadd.f32 %v956_v27, %v1260_v16  ;;  %981 = vmatprep.mubr.bf16.mxu0 %v476_v20  ;;  %v1332_v40 = vadd.f32 %v433_v32, %v407_v31  ;;  %v739_v27 = vmul.f32 0.1, %v1270_v37  ;;  %v740_v37 = vmul.f32 0.1, %v1292_v52 }
 0x226   :  { %v409_v38 = vpop.f32.mrf.mxu1  ;;  %982 = vmatmul.mubr.bf16.gmra.mxu0 %v477_v28  ;;  %v746_v52 = vmul.f32 0.1, %v1316_v19  ;;  %v745_v19 = vmul.f32 0.1, %v1314_v21  ;;  %p1120_p4 = por %p1119_p3, %p1118_p2 }
 0x227   :  { %v410_v30 = vadd.f32 %v1260_v16, %v409_v38  ;;  %v1330_v5 = vadd.f32 %v436_v23, %v418_v33 }
 0x228   :  { %p1121_p5 = pnand %p1120_p4, %p1114_p1 }
 0x229   :  { %v1334_v41 = vadd.f32 %v434_v34, %v410_v30  ;;  %v479_v26 = vpack.c.bf16 %v1330_v5, %v1336_v25  ;;  %v751_v21 = vmul.f32 0.1, %v1330_v5 }
 0x22b   :  { %v478_v11 = vpack.c.bf16 %v1334_v41, %v1332_v40 }
 0x22d   :  { %985 = vmatprep.mubr.bf16.mxu0 %v478_v11 }
 0x22e   :  { %986 = vmatmul.mubr.bf16.gmra.mxu0 %v479_v26 }
 0x2d6   :  { %v975_v29 = vpop.f32.mrf.mxu0 }
 0x2d8   :  { %v562_v42 = vpop.f32.mrf.mxu0 }
 0x2da   :  { %v976_v43 = vpop.f32.mrf.mxu0 }
 0x2db   :  { %v626_v7 = vpack.c.bf16 %v976_v43, %v975_v29 }
 0x2dc   :  { %v565_v16 = vpop.f32.mrf.mxu0 }
 0x2dd   :  { %v625_v8 = vpack.c.bf16 %v565_v16, %v562_v42 }
 0x2de   :  { %v979_v44 = vpop.f32.mrf.mxu0 }
 0x2e0   :  { %v578_v45 = vpop.f32.mrf.mxu0 }
 0x2e2   :  { %v980_v46 = vpop.f32.mrf.mxu0 }
 0x2e3   :  { %v628_v60 = vpack.c.bf16 %v980_v46, %v979_v44 }
 0x2e4   :  { %v581_v47 = vpop.f32.mrf.mxu0 }
 0x2e5   :  { %v627_v61 = vpack.c.bf16 %v581_v47, %v578_v45 }
 0x2e6   :  { %v983_v48 = vpop.f32.mrf.mxu0 }
 0x2e8   :  { %v594_v49 = vpop.f32.mrf.mxu0 }
 0x2ea   :  { %v984_v50 = vpop.f32.mrf.mxu0 }
 0x2eb   :  { %v630_v58 = vpack.c.bf16 %v984_v50, %v983_v48 }
 0x2ec   :  { %v597_v18 = vpop.f32.mrf.mxu0 }
 0x2ed   :  { %v629_v59 = vpack.c.bf16 %v597_v18, %v594_v49 }
 0x2ee   :  { %v987_v54 = vpop.f32.mrf.mxu0 }
 0x2f0   :  { %v610_v14 = vpop.f32.mrf.mxu0 }
 0x2f2   :  { %v988_v55 = vpop.f32.mrf.mxu0 }
 0x2f3   :  { %v632_v17 = vpack.c.bf16 %v988_v55, %v987_v54 }
 0x2f4   :  { %v613_v56 = vpop.f32.mrf.mxu0 }
 0x2f5   :  { %v631_v57 = vpack.c.bf16 %v613_v56, %v610_v14  ;;  %989 = vmatprep.subr.bf16.mxu1 %v632_v17 }
 0x2f6   :  { %990 = vmatpush3.bf16.msra.mxu1 %v632_v17 }
 0x2f7   :  { %991 = vmatprep.subr.bf16.mxu1 %v631_v57 }
 0x2fa   :  { %992 = vmatpush3.bf16.msra.mxu1 %v631_v57 }
 0x2fb   :  { %993 = vmatprep.subr.bf16.mxu1 %v630_v58 }
 0x2fe   :  { %994 = vmatpush3.bf16.msra.mxu1 %v630_v58 }
 0x2ff   :  { %995 = vmatprep.subr.bf16.mxu1 %v629_v59 }
 0x302   :  { %996 = vmatpush3.bf16.msra.mxu1 %v629_v59 }
 0x303   :  { %997 = vmatprep.subr.bf16.mxu1 %v628_v60 }
 0x306   :  { %998 = vmatpush3.bf16.msra.mxu1 %v628_v60 }
 0x307   :  { %999 = vmatprep.subr.bf16.mxu1 %v627_v61 }
 0x30a   :  { %1000 = vmatpush3.bf16.msra.mxu1 %v627_v61 }
 0x30b   :  { %1001 = vmatprep.subr.bf16.mxu1 %v626_v7 }
 0x30e   :  { %1002 = vmatpush3.bf16.msra.mxu1 %v626_v7 }
 0x30f   :  { %1003 = vmatprep.subr.bf16.mxu1 %v625_v8 }
 0x312   :  { %1004 = vmatpush3.bf16.msra.mxu1 %v625_v8 }
 0x315   :  { %1006 = vmatmul.mubr.bf16.vlgmr.msra.gmra.mxu1 %v1235_v62 }
 0x316   :  { %1009 = vmatprep.mubr.bf16.mxu1 %v1237_v63  ;;  %v738_v63 = vmul.f32 0.1, %v1276_v4  ;;  %v737_v4 = vmul.f32 0.1, %v1274_v12  ;;  %v743_v12 = vmul.f32 0.1, %v1290_v51 }
 0x317   :  { %v744_v51 = vmul.f32 0.1, %v1312_v15  ;;  %v750_v15 = vmul.f32 0.1, %v1336_v25 }
 0x31d   :  { %1010 = vmatmul.mubr.bf16.gmra.mxu1 %v1241_v0 }
 0x31e   :  { %1013 = vmatprep.mubr.bf16.mxu1 %v1243_v1 }
 0x325   :  { %1014 = vmatmul.mubr.bf16.gmra.mxu1 %v1247_v2  ;;  %v736_v2 = vmul.f32 0.1, %v1272_v39  ;;  %v742_v39 = vmul.f32 0.1, %v1296_v13  ;;  %v741_v13 = vmul.f32 0.1, %v1294_v53 }
 0x326   :  { %1017 = vmatprep.mubr.bf16.mxu1 %v1249_v3  ;;  %v747_v53 = vmul.f32 0.1, %v1310_v9  ;;  %v748_v9 = vmul.f32 0.1, %v1332_v40 }
 0x32d   :  { %1018 = vmatmul.mubr.bf16.gmra.mxu1 %v1253_v6 }
 0x3d5   :  { %v1007_v10 = vpop.f32.mrf.mxu1 }
 0x3d6   :  { %v682_v62 = vadd.f32 %v1007_v10, %v1352_v24 }
 0x3d7   :  { %v673_v22 = vpop.f32.mrf.mxu1 }
 0x3d8   :  { %v754_v0 = vadd.f32 %v738_v63, %v682_v62  ;;  %v674_v1 = vadd.f32 %v1352_v24, %v673_v22  ;;  %v749_v63 = vmul.f32 0.1, %v1334_v41 }
 0x3d9   :  { %v1008_v20 = vpop.f32.mrf.mxu1 }
 0x3da   :  { %770 = vst [vmem:[#allocation8 + $0x10] sm:$0xff] %v754_v0  ;;  %v752_v3 = vadd.f32 %v736_v2, %v674_v1  ;;  %v685_v6 = vadd.f32 %v1008_v20, %v1352_v24 }
 0x3db   :  { %v676_v23 = vpop.f32.mrf.mxu1 }
 0x3dc   :  { %768 = vst [vmem:[#allocation8] sm:$0xff] %v752_v3  ;;  %v755_v28 = vadd.f32 %v739_v27, %v685_v6  ;;  %v677_v31 = vadd.f32 %v1352_v24, %v676_v23 }
 0x3dd   :  { %v1011_v32 = vpop.f32.mrf.mxu1 }
 0x3de   :  { %771 = vst [vmem:[#allocation8 + $0x18] sm:$0xff] %v755_v28  ;;  %v753_v33 = vadd.f32 %v737_v4, %v677_v31  ;;  %v698_v34 = vadd.f32 %v1011_v32, %v1352_v24 }
 0x3df   :  { %v689_v35 = vpop.f32.mrf.mxu1 }
 0x3e0   :  { %769 = vst [vmem:[#allocation8 + $0x8] sm:$0xff] %v753_v33  ;;  %v758_v36 = vadd.f32 %v742_v39, %v698_v34  ;;  %v690_v38 = vadd.f32 %v1352_v24, %v689_v35 }
 0x3e1   :  { %v1012_v30 = vpop.f32.mrf.mxu1 }
 0x3e2   :  { %774 = vst [vmem:[#allocation8 + $0x30] sm:$0xff] %v758_v36  ;;  %v756_v11 = vadd.f32 %v740_v37, %v690_v38  ;;  %v701_v26 = vadd.f32 %v1012_v30, %v1352_v24 }
 0x3e3   :  { %v692_v29 = vpop.f32.mrf.mxu1 }
 0x3e4   :  { %772 = vst [vmem:[#allocation8 + $0x20] sm:$0xff] %v756_v11  ;;  %v759_v42 = vadd.f32 %v743_v12, %v701_v26  ;;  %v693_v43 = vadd.f32 %v1352_v24, %v692_v29 }
 0x3e5   :  { %v1015_v16 = vpop.f32.mrf.mxu1 }
 0x3e6   :  { %775 = vst [vmem:[#allocation8 + $0x38] sm:$0xff] %v759_v42  ;;  %v757_v44 = vadd.f32 %v741_v13, %v693_v43  ;;  %v714_v45 = vadd.f32 %v1015_v16, %v1352_v24 }
 0x3e7   :  { %v705_v46 = vpop.f32.mrf.mxu1 }
 0x3e8   :  { %773 = vst [vmem:[#allocation8 + $0x28] sm:$0xff] %v757_v44  ;;  %v762_v47 = vadd.f32 %v746_v52, %v714_v45  ;;  %v706_v48 = vadd.f32 %v1352_v24, %v705_v46 }
 0x3e9   :  { %v1016_v49 = vpop.f32.mrf.mxu1 }
 0x3ea   :  { %778 = vst [vmem:[#allocation8 + $0x50] sm:$0xff] %v762_v47  ;;  %v760_v50 = vadd.f32 %v744_v51, %v706_v48  ;;  %v717_v18 = vadd.f32 %v1016_v49, %v1352_v24 }
 0x3eb   :  { %v708_v54 = vpop.f32.mrf.mxu1 }
 0x3ec   :  { %776 = vst [vmem:[#allocation8 + $0x40] sm:$0xff] %v760_v50  ;;  %v763_v14 = vadd.f32 %v747_v53, %v717_v18  ;;  %v709_v55 = vadd.f32 %v1352_v24, %v708_v54 }
 0x3ed   :  { %v1019_v17 = vpop.f32.mrf.mxu1 }
 0x3ee   :  { %779 = vst [vmem:[#allocation8 + $0x58] sm:$0xff] %v763_v14  ;;  %v761_v56 = vadd.f32 %v745_v19, %v709_v55  ;;  %v730_v57 = vadd.f32 %v1019_v17, %v1352_v24 }
 0x3ef   :  { %v721_v58 = vpop.f32.mrf.mxu1 }
 0x3f0   :  { %777 = vst [vmem:[#allocation8 + $0x48] sm:$0xff] %v761_v56  ;;  %v766_v59 = vadd.f32 %v750_v15, %v730_v57  ;;  %v722_v60 = vadd.f32 %v1352_v24, %v721_v58 }
 0x3f1   :  { %v1020_v61 = vpop.f32.mrf.mxu1 }
 0x3f2   :  { %782 = vst [vmem:[#allocation8 + $0x70] sm:$0xff] %v766_v59  ;;  %v764_v7 = vadd.f32 %v748_v9, %v722_v60  ;;  %v733_v8 = vadd.f32 %v1020_v61, %v1352_v24 }
 0x3f3   :  { %v724_v10 = vpop.f32.mrf.mxu1 }
 0x3f4   :  { %780 = vst [vmem:[#allocation8 + $0x60] sm:$0xff] %v764_v7  ;;  %v767_v62 = vadd.f32 %v751_v21, %v733_v8  ;;  %v725_v25 = vadd.f32 %v1352_v24, %v724_v10 }
 0x3f6   :  { %783 = vst [vmem:[#allocation8 + $0x78] sm:$0xff] %v767_v62  ;;  %v765_v22 = vadd.f32 %v749_v63, %v725_v25 }
 0x3f8   :  { %781 = vst [vmem:[#allocation8 + $0x68] sm:$0xff] %v765_v22 }
 0x3f9   :  { %1124 = shalt.err (!%p1121_p5)
}
 0x3fa   :  { %795 = dma.vmem_to_hbm [thread:$0]  %s790_s9, 2048, %s1396_s4, [#allocation4], %s1140_s18, %s1140_s18, %s1141_s19  }
 0x3fb   :  { %1137 = dma.done.wait [#allocation4], 2048  }
 0x3fc   :  { %1138 = vsyncadd [#allocation4], 4294965248 }
 0x3fd   :  { %799 = vsyncpa [#allocation3], 1 }
 0x3fe   :  { %800 = vsyncpa [#allocation6], 1 }
 0x3ff   :  { %801 = vsyncpa [#allocation4], 1 }

</bundles_post_ra>
